<compile_context>
chip_gen: v7x
topology: tpu7x:2x2x1
jax: 0.10.0
libtpu: 0.0.40
codegen_flags: <defaults>
</compile_context>

<pallas_src>
import math

import jax
import jax.numpy as jnp
from jax import lax
from jax.experimental import pallas as pl
from jax.experimental.pallas import tpu as pltpu

FEATURE_DIM = 2                      # module constant (self.feature_dim)
TIME_STEPS = 100                     # encoding_time=Linear(100,1), decoding_time=Linear(1,100)
NUM_CHANNELS = 2 * FEATURE_DIM + 1   # = 5 (forced by encoding_features_3 input_size=1)

_VMEM_LIMIT = 48 * 1024 * 1024       # explicit scoped-VMEM cap (headroom on v7x's 64 MiB)


def _round_up(x, m):
    return ((x + m - 1) // m) * m


def _row_tile(n, target=256):
    """Largest row tile <= target that divides n and is a multiple of 16 (bf16-safe).

    v6e/v7x MXU is 256-wide, v5e is 128-wide; `target` defaults to 256 and the demo
    (n=32) degenerates to a single full-extent block (grid=(1,)).
    """
    if n <= target:
        return n
    tm = (min(target, n) // 16) * 16
    while tm >= 16:
        if n % tm == 0:
            return tm
        tm -= 16
    return n


# ----------------------------------------------------------------------------
# Pallas kernels: two-phase row-tiled GCN encoder + UnitNorm + fused decoder
# ----------------------------------------------------------------------------
def _gcn_phase1_kernel(a_ref, dc_ref, dr_ref, w1_ref, b1_ref, w2_ref, t_ref):
    """t_i = relu(A_norm[i,:] @ W1 + b1) @ W2 for one row tile i.

    Symmetric normalization + bf16 cast of A are fused here (A arrives raw f32).
    Features('diag') => X = I, so layer 1's X @ W1 == W1 (identity matmul gone).
    """
    a_n = (a_ref[...] * dc_ref[...] * dr_ref[...]).astype(jnp.bfloat16)
    h = jnp.dot(a_n, w1_ref[...], preferred_element_type=jnp.float32) + b1_ref[...]
    h = jnp.maximum(h, 0.0)
    t_ref[...] = jnp.dot(h.astype(jnp.bfloat16), w2_ref[...],
                         preferred_element_type=jnp.float32).astype(jnp.bfloat16)


def _gcn_phase2_kernel(a_ref, dc_ref, dr_ref, t_ref, b2_ref, rand_ref, wxy_ref,
                       xy_ref):
    """z_i = A_norm[i,:] @ T + b2 -> UnitNorm -> fused (x,y) decoders, per row tile."""
    a_n = (a_ref[...] * dc_ref[...] * dr_ref[...]).astype(jnp.bfloat16)
    z = jnp.dot(a_n, t_ref[...], preferred_element_type=jnp.float32) + b2_ref[...]

    # UnitNorm: all-zero rows are replaced by precomputed gaussians, then
    # L2-normalized.  ss > 0 <=> "row has a nonzero element" (up to f32 underflow
    # of the squared sum — documented deviation from the exact (z != 0) test).
    ss = jnp.sum(z * z, axis=1, keepdims=True)
    valid = ss > 0.0
    rand = rand_ref[...]
    z = jnp.where(valid, z, rand)
    ss = jnp.where(valid, ss, jnp.sum(rand * rand, axis=1, keepdims=True))
    z = z * lax.rsqrt(ss)

    # nn.Dropout(p) is the identity in eval mode.  Fused x/y decoder: single
    # lane-dense (Hd, 128k) matmul, one unmasked store.  (bf16 cast of the
    # normalized z loses ~3 decimal digits vs an f32 torch reference.)
    xy_ref[...] = jnp.dot(z.astype(jnp.bfloat16), wxy_ref[...],
                          preferred_element_type=jnp.float32)


def gcn_encode_decode(a, d_col, d_row, w1_bf16, b1, w2_bf16, b2, rand, wxy_bf16,
                      *, row_tile_target=256):
    n = a.shape[0]
    hd = w1_bf16.shape[1]
    dp = wxy_bf16.shape[1]
    tm = _row_tile(n, row_tile_target)
    grid = (n // tm,)
    cp = pltpu.CompilerParams(dimension_semantics=("parallel",),
                              vmem_limit_bytes=_VMEM_LIMIT)

    t = pl.pallas_call(
        _gcn_phase1_kernel,
        out_shape=jax.ShapeDtypeStruct((n, hd), jnp.bfloat16),
        grid=grid,
        in_specs=[
            pl.BlockSpec((tm, n), lambda i: (i, 0)),    # raw A rows (f32)
            pl.BlockSpec((tm, 1), lambda i: (i, 0)),    # D^-1/2 (rows)
            pl.BlockSpec((1, n), lambda i: (0, 0)),     # D^-1/2 (cols, resident)
            pl.BlockSpec((n, hd), lambda i: (0, 0)),    # W1 bf16 (resident)
            pl.BlockSpec((1, hd), lambda i: (0, 0)),    # b1 f32
            pl.BlockSpec((hd, hd), lambda i: (0, 0)),   # W2 bf16 (resident)
        ],
        out_specs=pl.BlockSpec((tm, hd), lambda i: (i, 0)),
        compiler_params=cp,
    )(a, d_col, d_row, w1_bf16, b1, w2_bf16)

    xy = pl.pallas_call(
        _gcn_phase2_kernel,
        out_shape=jax.ShapeDtypeStruct((n, dp), jnp.float32),
        grid=grid,
        in_specs=[
            pl.BlockSpec((tm, n), lambda i: (i, 0)),    # raw A rows (f32)
            pl.BlockSpec((tm, 1), lambda i: (i, 0)),
            pl.BlockSpec((1, n), lambda i: (0, 0)),
            pl.BlockSpec((n, hd), lambda i: (0, 0)),    # T bf16 (resident)
            pl.BlockSpec((1, hd), lambda i: (0, 0)),    # b2 f32
            pl.BlockSpec((tm, hd), lambda i: (i, 0)),   # UnitNorm gaussians (f32)
            pl.BlockSpec((hd, dp), lambda i: (0, 0)),   # fused decoder W bf16
        ],
        out_specs=pl.BlockSpec((tm, dp), lambda i: (i, 0)),
        compiler_params=cp,
    )(a, d_col, d_row, t, b2, rand, wxy_bf16)
    return xy


# ----------------------------------------------------------------------------
# Pallas kernel: 3 decoder LSTMs (sequence length = num_nodes) in one fori_loop
# ----------------------------------------------------------------------------
def _lstm_chain_kernel(gx_ref, whh0_ref, whh1_ref, hseq_ref):
    """Serial LSTM recurrence over the node axis, all 3 LSTMs batched.

    gx_ref:   (N, 3, 8) precomputed x_t @ W_ih^T + b_ih + b_hh  (gate order i,f,g,o)
    whh0/1:   (3, 8)    columns of W_hh (contribution of h[:,0] / h[:,1])
    hseq_ref: (N, 3, 2) hidden-state sequence output
    State (h, c) is a pair of (3, 2) f32 values carried in vregs; the hidden
    matmul (hidden size 2) is done as two VPU broadcast-multiplies, no MXU.
    """
    n = gx_ref.shape[0]
    whh0 = whh0_ref[...]
    whh1 = whh1_ref[...]

    def step(t, carry):
        h, c = carry                                                  # (3, 2)
        g = gx_ref[t] + whh0 * h[:, 0:1] + whh1 * h[:, 1:2]           # (3, 8)
        i_g = jax.nn.sigmoid(g[:, 0:2])
        f_g = jax.nn.sigmoid(g[:, 2:4])
        g_g = jnp.tanh(g[:, 4:6])
        o_g = jax.nn.sigmoid(g[:, 6:8])
        c_new = f_g * c + i_g * g_g
        h_new = o_g * jnp.tanh(c_new)
        hseq_ref[t] = h_new
        return (h_new, c_new)

    zeros = jnp.zeros((3, 2), jnp.float32)
    lax.fori_loop(0, n, step, (zeros, zeros))


def lstm_chain(gx, whh0, whh1):
    n = gx.shape[0]
    return pl.pallas_call(
        _lstm_chain_kernel,
        out_shape=jax.ShapeDtypeStruct((n, 3, 2), jnp.float32),
        grid=(1,),
        in_specs=[
            pl.BlockSpec((n, 3, 8), lambda i: (0, 0, 0)),
            pl.BlockSpec((3, 8), lambda i: (0, 0)),
            pl.BlockSpec((3, 8), lambda i: (0, 0)),
        ],
        out_specs=pl.BlockSpec((n, 3, 2), lambda i: (0, 0, 0)),
        compiler_params=pltpu.CompilerParams(dimension_semantics=("arbitrary",)),
    )(gx, whh0, whh1)


# ----------------------------------------------------------------------------
# Plain-JAX glue: graph construction, parameter init
# ----------------------------------------------------------------------------
def build_graph(edge_index, num_nodes):
    """Raw dense A (+ self loops) and D^-1/2 vectors.

    The symmetric normalization and the bf16 cast of A are fused into the Pallas
    kernels, so A leaves here raw f32 (saves two full N^2 HBM passes per call).
    """
    a = jnp.zeros((num_nodes, num_nodes), jnp.float32)
    a = a.at[edge_index[0], edge_index[1]].add(1.0)
    a = a + jnp.eye(num_nodes, dtype=jnp.float32)
    # degree from the edge list (avoids an extra N^2 read of A for the row sum)
    deg = jnp.zeros((num_nodes,), jnp.float32).at[edge_index[0]].add(1.0) + 1.0
    d_inv_sqrt = lax.rsqrt(jnp.maximum(deg, 1e-12))
    return a, d_inv_sqrt[:, None], d_inv_sqrt[None, :]


def _uniform(key, shape, bound):
    return jax.random.uniform(key, shape, jnp.float32, -bound, bound)


def _init_dense(key, in_f, out_f, bias=True):
    kw, kb = jax.random.split(key)
    bound = 1.0 / math.sqrt(in_f)
    w = _uniform(kw, (in_f, out_f), bound)
    b = _uniform(kb, (1, out_f), bound) if bias else jnp.zeros((1, out_f), jnp.float32)
    return w, b


def _init_lstm(key, in_f, hidden):
    ks = jax.random.split(key, 4)
    bound = 1.0 / math.sqrt(hidden)
    return (_uniform(ks[0], (4 * hidden, in_f), bound),     # w_ih
            _uniform(ks[1], (4 * hidden, hidden), bound),   # w_hh
            _uniform(ks[2], (4 * hidden,), bound),          # b_ih
            _uniform(ks[3], (4 * hidden,), bound))          # b_hh


def _dec_lstm_rows(w_ih, w_hh, b_ih, b_hh, h_real):
    """PyTorch LSTM (input=1, hidden=h_real<=2) -> 8-gate-row form, hidden padded
    to 2 with zeros (exact: padded units stay 0 and never feed back)."""
    h_pad = FEATURE_DIM                          # = 2
    w_row = jnp.zeros((4 * h_pad,), jnp.float32)
    whh0 = jnp.zeros((4 * h_pad,), jnp.float32)
    whh1 = jnp.zeros((4 * h_pad,), jnp.float32)
    bias = jnp.zeros((4 * h_pad,), jnp.float32)
    for g in range(4):                           # gate blocks (i, f, g, o)
        src = slice(g * h_real, (g + 1) * h_real)
        dst = slice(g * h_pad, g * h_pad + h_real)
        w_row = w_row.at[dst].set(w_ih[src, 0])
        whh0 = whh0.at[dst].set(w_hh[src, 0])
        if h_real > 1:
            whh1 = whh1.at[dst].set(w_hh[src, 1])
        bias = bias.at[dst].set(b_ih[src] + b_hh[src])
    return w_row, whh0, whh1, bias


def init_svga_params(key, num_nodes, hidden_size, num_classes):
    keys = jax.random.split(key, 10)
    hp = _round_up(hidden_size, 128)             # lane-dense hidden (zero pad is exact)
    p = {}

    # TODO(synk): GNN/SGC encoder classes are not defined in the provided source;
    # the encoder is implemented as a standard 2-layer GCN (A_norm @ X @ W + b).
    # With x_type='diag' the GCN input feature dim equals num_nodes.
    w1, b1 = _init_dense(keys[0], num_nodes, hidden_size)
    w2, b2 = _init_dense(keys[1], hidden_size, hidden_size)
    w1p = jnp.zeros((num_nodes, hp), jnp.float32).at[:, :hidden_size].set(w1)
    b1p = jnp.zeros((1, hp), jnp.float32).at[:, :hidden_size].set(b1)
    w2p = jnp.zeros((hp, hp), jnp.float32).at[:hidden_size, :hidden_size].set(w2)
    b2p = jnp.zeros((1, hp), jnp.float32).at[:, :hidden_size].set(b2)

    x_dec_w, _ = _init_dense(keys[2], hidden_size, FEATURE_DIM + 1, bias=False)
    y_dec_w, _ = _init_dense(keys[3], hidden_size, num_classes, bias=False)
    d_xy = FEATURE_DIM + 1 + num_classes
    dp = _round_up(max(d_xy, 128), 128)
    wxy = jnp.zeros((hp, dp), jnp.float32)
    wxy = wxy.at[:hidden_size, :FEATURE_DIM + 1].set(x_dec_w)
    wxy = wxy.at[:hidden_size, FEATURE_DIM + 1:d_xy].set(y_dec_w)

    # bf16 matmul operands are cast ONCE here (hoisted out of the per-call path).
    p['gcn_w1_bf16'] = w1p.astype(jnp.bfloat16)
    p['gcn_b1'] = b1p
    p['gcn_w2_bf16'] = w2p.astype(jnp.bfloat16)
    p['gcn_b2'] = b2p
    p['dec_xy_w_bf16'] = wxy.astype(jnp.bfloat16)

    # Decoder LSTM chain (hidden sizes 2, 2, 1 -> LSTM3 padded to 2, exact).
    lstm_specs = [(keys[4], 1, FEATURE_DIM), (keys[5], 1, FEATURE_DIM), (keys[6], 1, 1)]
    rows = [_dec_lstm_rows(*_init_lstm(k, i, h), h) for (k, i, h) in lstm_specs]
    p['dec_w_ih'] = jnp.stack([r[0] for r in rows])   # (3, 8)
    p['dec_whh0'] = jnp.stack([r[1] for r in rows])   # (3, 8)
    p['dec_whh1'] = jnp.stack([r[2] for r in rows])   # (3, 8)
    p['dec_bias'] = jnp.stack([r[3] for r in rows])   # (3, 8)

    # decoding_time = Linear(1, 100): weight stored transposed as (1, 100).
    p['dec_time_w'] = _uniform(keys[7], (1, TIME_STEPS), 1.0)
    p['dec_time_b'] = _uniform(keys[8], (1, TIME_STEPS), 1.0)

    # NOTE: encoding_time / encoding_features_* parameters are intentionally not
    # created: that path is dead under x_type='diag' (Features('diag') ignores it).
    return p


def make_unitnorm_rand(key, num_nodes, hidden_size, hidden_pad):
    r = jax.random.normal(key, (num_nodes, hidden_size), jnp.float32)
    if hidden_pad > hidden_size:
        r = jnp.pad(r, ((0, 0), (0, hidden_pad - hidden_size)))
    return r


# ----------------------------------------------------------------------------
# SVGA forward (eval mode, for_loss=False) -> (x_hat, y_hat)
# ----------------------------------------------------------------------------
def svga_forward(params, edge_index, num_nodes, num_classes, unitnorm_rand):
    a, d_col, d_row = build_graph(edge_index, num_nodes)

    # Two-phase row-tiled GCN encoder + UnitNorm + fused x/y decoder (Pallas).
    xy = gcn_encode_decode(a, d_col, d_row,
                           params['gcn_w1_bf16'], params['gcn_b1'],
                           params['gcn_w2_bf16'], params['gcn_b2'],
                           unitnorm_rand, params['dec_xy_w_bf16'])
    x_dec = xy[:, :FEATURE_DIM + 1]                                    # (N, 3)
    y_hat = xy[:, FEATURE_DIM + 1:FEATURE_DIM + 1 + num_classes]       # (N, C)

    # Decoder LSTM chain: input-gate projections precomputed as one fused XLA op,
    # the serial recurrence runs inside a single Pallas kernel.
    gx = (x_dec[:, :, None] * params['dec_w_ih'][None, :, :]
          + params['dec_bias'][None, :, :])                            # (N, 3, 8)
    hseq = lstm_chain(gx, params['dec_whh0'], params['dec_whh1'])      # (N, 3, 2)
    xh = jnp.concatenate([hseq[:, 0, :], hseq[:, 1, :], hseq[:, 2, :1]], axis=1)  # (N, 5)

    # decoding_time = Linear(1, 100): broadcast outer product, plain jnp.
    x_hat = xh.reshape(-1, 1) * params['dec_time_w'] + params['dec_time_b']  # (N*5, 100)
    # The torch reference uses .reshape (row-major), NOT permute, for the final
    # (N,5,100) -> (N,100,5) step; we match that exactly.
    x_hat = x_hat.reshape(num_nodes, NUM_CHANNELS, TIME_STEPS)
    x_hat = x_hat.reshape(num_nodes, TIME_STEPS, NUM_CHANNELS)
    return x_hat, y_hat


if __name__ == "__main__":
    num_nodes = 32
    hidden_size = 128          # lane-dense hidden (module default is 256)
    num_classes = 8

    key = jax.random.PRNGKey(0)
    k_param, k_rand = jax.random.split(key)

    # small deterministic graph: bidirectional ring
    src = jnp.arange(num_nodes, dtype=jnp.int32)
    dst = (src + 1) % num_nodes
    edge_index = jnp.concatenate(
        [jnp.stack([src, dst]), jnp.stack([dst, src])], axis=1)   # (2, 2N)

    params = init_svga_params(k_param, num_nodes, hidden_size, num_classes)
    hidden_pad = params['gcn_b1'].shape[1]
    unitnorm_rand = make_unitnorm_rand(k_rand, num_nodes, hidden_size, hidden_pad)

    fwd = jax.jit(svga_forward, static_argnums=(2, 3))
    x_hat, y_hat = fwd(params, edge_index, num_nodes, num_classes, unitnorm_rand)
    jax.block_until_ready((x_hat, y_hat))

    assert x_hat.shape == (num_nodes, TIME_STEPS, NUM_CHANNELS)
    assert y_hat.shape == (num_nodes, num_classes)
    assert bool(jnp.all(jnp.isfinite(x_hat))) and bool(jnp.all(jnp.isfinite(y_hat)))
    print("KERNEL_OK")
</pallas_src>

<mosaic_0001>
module attributes {stable_mosaic.version = 11 : i64} {
  func.func private @main(%arg0: i32) attributes {dimension_semantics = [#tpu.dimension_semantics<core_parallel>], iteration_bounds = array<i64: 2>, tpu.core_type = #tpu.core_type<sc_scalar_subcore>, window_params = []} {
    return
  }
}

module attributes {stable_mosaic.version = 11 : i64} {
  func.func private @main(%arg0: i32) attributes {dimension_semantics = [#tpu.dimension_semantics<core_parallel>], iteration_bounds = array<i64: 2>, tpu.core_type = #tpu.core_type<sc_scalar_subcore>, window_params = []} {
    return
  }
}

module attributes {stable_mosaic.version = 11 : i64} {
  func.func @_gcn_phase2_kernel(%arg0: i32, %arg1: memref<32x32xf32, #tpu.memory_space<vmem>>, %arg2: memref<32x1xf32, #tpu.memory_space<vmem>>, %arg3: memref<1x32xf32, #tpu.memory_space<vmem>>, %arg4: memref<32x128xbf16, #tpu.memory_space<vmem>>, %arg5: memref<1x128xf32, #tpu.memory_space<vmem>>, %arg6: memref<32x128xf32, #tpu.memory_space<vmem>>, %arg7: memref<128x128xbf16, #tpu.memory_space<vmem>>, %arg8: memref<32x128xf32, #tpu.memory_space<vmem>>) attributes {dimension_semantics = [#tpu.dimension_semantics<parallel>], iteration_bounds = array<i64: 1>, scalar_prefetch = 0 : i64, scratch_operands = 0 : i64, tpu.core_type = #tpu.core_type<tc>, window_params = [{transform_indices = @transform_0, window_bounds = array<i64: 32, 32>}, {transform_indices = @transform_1, window_bounds = array<i64: 32, 1>}, {pipeline_mode = #tpu.pipeline_mode<synchronous>, transform_indices = @transform_2, window_bounds = array<i64: 1, 32>}, {pipeline_mode = #tpu.pipeline_mode<synchronous>, transform_indices = @transform_3, window_bounds = array<i64: 32, 128>}, {pipeline_mode = #tpu.pipeline_mode<synchronous>, transform_indices = @transform_4, window_bounds = array<i64: 1, 128>}, {transform_indices = @transform_5, window_bounds = array<i64: 32, 128>}, {pipeline_mode = #tpu.pipeline_mode<synchronous>, transform_indices = @transform_6, window_bounds = array<i64: 128, 128>}, {transform_indices = @transform_7, window_bounds = array<i64: 32, 128>}]} {
    %c0 = arith.constant 0 : index
    %c0_0 = arith.constant 0 : index
    %0 = vector.load %arg1[%c0, %c0_0] : memref<32x32xf32, #tpu.memory_space<vmem>>, vector<32x32xf32>
    %c0_1 = arith.constant 0 : index
    %c0_2 = arith.constant 0 : index
    %1 = vector.load %arg2[%c0_1, %c0_2] : memref<32x1xf32, #tpu.memory_space<vmem>>, vector<32x1xf32>
    %2 = vector.broadcast %1 : vector<32x1xf32> to vector<32x32xf32>
    %3 = arith.mulf %0, %2 : vector<32x32xf32>
    %c0_3 = arith.constant 0 : index
    %c0_4 = arith.constant 0 : index
    %4 = vector.load %arg3[%c0_3, %c0_4] : memref<1x32xf32, #tpu.memory_space<vmem>>, vector<1x32xf32>
    %5 = vector.broadcast %4 : vector<1x32xf32> to vector<32x32xf32>
    %6 = arith.mulf %3, %5 : vector<32x32xf32>
    %7 = arith.truncf %6 : vector<32x32xf32> to vector<32x32xbf16>
    %c0_5 = arith.constant 0 : index
    %c0_6 = arith.constant 0 : index
    %8 = vector.load %arg4[%c0_5, %c0_6] : memref<32x128xbf16, #tpu.memory_space<vmem>>, vector<32x128xbf16>
    %cst = arith.constant dense<0.000000e+00> : vector<32x128xf32>
    %9 = tpu.matmul %7, %8, %cst {dimension_numbers = #tpu.dot_dimension_numbers<[1], [0], [0], [1], [0, 0, 1, 1], [], []>} : vector<32x32xbf16>, vector<32x128xbf16>, vector<32x128xf32> -> vector<32x128xf32>
    %c0_7 = arith.constant 0 : index
    %c0_8 = arith.constant 0 : index
    %10 = vector.load %arg5[%c0_7, %c0_8] : memref<1x128xf32, #tpu.memory_space<vmem>>, vector<1x128xf32>
    %11 = vector.broadcast %10 : vector<1x128xf32> to vector<32x128xf32>
    %12 = arith.addf %9, %11 : vector<32x128xf32>
    %13 = arith.mulf %12, %12 : vector<32x128xf32>
    %cst_9 = arith.constant dense<0.000000e+00> : vector<32xf32>
    %14 = vector.multi_reduction <add>, %13, %cst_9 [1] : vector<32x128xf32> to vector<32xf32>
    %15 = vector.shape_cast %14 : vector<32xf32> to vector<32x1xf32>
    %cst_10 = arith.constant 0.000000e+00 : f32
    %16 = vector.broadcast %cst_10 : f32 to vector<32x1xf32>
    %17 = arith.cmpf ogt, %15, %16 : vector<32x1xf32>
    %c0_11 = arith.constant 0 : index
    %c0_12 = arith.constant 0 : index
    %18 = vector.load %arg6[%c0_11, %c0_12] : memref<32x128xf32, #tpu.memory_space<vmem>>, vector<32x128xf32>
    %19 = vector.shape_cast %17 : vector<32x1xi1> to vector<32x1xi1>
    %20 = vector.broadcast %19 : vector<32x1xi1> to vector<32x128xi1>
    %21 = arith.select %20, %12, %18 : vector<32x128xi1>, vector<32x128xf32>
    %22 = arith.mulf %18, %18 : vector<32x128xf32>
    %cst_13 = arith.constant dense<0.000000e+00> : vector<32xf32>
    %23 = vector.multi_reduction <add>, %22, %cst_13 [1] : vector<32x128xf32> to vector<32xf32>
    %24 = vector.shape_cast %23 : vector<32xf32> to vector<32x1xf32>
    %25 = arith.select %17, %15, %24 : vector<32x1xi1>, vector<32x1xf32>
    %26 = math.rsqrt %25 : vector<32x1xf32>
    %27 = vector.broadcast %26 : vector<32x1xf32> to vector<32x128xf32>
    %28 = arith.mulf %21, %27 : vector<32x128xf32>
    %29 = arith.truncf %28 : vector<32x128xf32> to vector<32x128xbf16>
    %c0_14 = arith.constant 0 : index
    %c0_15 = arith.constant 0 : index
    %30 = vector.load %arg7[%c0_14, %c0_15] : memref<128x128xbf16, #tpu.memory_space<vmem>>, vector<128x128xbf16>
    %cst_16 = arith.constant dense<0.000000e+00> : vector<32x128xf32>
    %31 = tpu.matmul %29, %30, %cst_16 {dimension_numbers = #tpu.dot_dimension_numbers<[1], [0], [0], [1], [0, 0, 1, 1], [], []>} : vector<32x128xbf16>, vector<128x128xbf16>, vector<32x128xf32> -> vector<32x128xf32>
    %c0_17 = arith.constant 0 : index
    %c0_18 = arith.constant 0 : index
    %32 = vector.load %arg8[%c0_17, %c0_18] : memref<32x128xf32, #tpu.memory_space<vmem>>, vector<32x128xf32>
    tpu.vector_store %arg8[%c0_17, %c0_18], %31 {strides = array<i32>} : memref<32x128xf32, #tpu.memory_space<vmem>>, vector<32x128xf32>,
    return
  }
  func.func @transform_0(%arg0: i32) -> (i32, i32) {
    %c0_i32 = arith.constant 0 : i32
    %c0_i32_0 = arith.constant 0 : i32
    return %arg0, %c0_i32 : i32, i32
  }
  func.func @transform_1(%arg0: i32) -> (i32, i32) {
    %c0_i32 = arith.constant 0 : i32
    %c0_i32_0 = arith.constant 0 : i32
    return %arg0, %c0_i32 : i32, i32
  }
  func.func @transform_2(%arg0: i32) -> (i32, i32) {
    %c0_i32 = arith.constant 0 : i32
    %c0_i32_0 = arith.constant 0 : i32
    %c0_i32_1 = arith.constant 0 : i32
    return %c0_i32, %c0_i32_0 : i32, i32
  }
  func.func @transform_3(%arg0: i32) -> (i32, i32) {
    %c0_i32 = arith.constant 0 : i32
    %c0_i32_0 = arith.constant 0 : i32
    %c0_i32_1 = arith.constant 0 : i32
    return %c0_i32, %c0_i32_0 : i32, i32
  }
  func.func @transform_4(%arg0: i32) -> (i32, i32) {
    %c0_i32 = arith.constant 0 : i32
    %c0_i32_0 = arith.constant 0 : i32
    %c0_i32_1 = arith.constant 0 : i32
    return %c0_i32, %c0_i32_0 : i32, i32
  }
  func.func @transform_5(%arg0: i32) -> (i32, i32) {
    %c0_i32 = arith.constant 0 : i32
    %c0_i32_0 = arith.constant 0 : i32
    return %arg0, %c0_i32 : i32, i32
  }
  func.func @transform_6(%arg0: i32) -> (i32, i32) {
    %c0_i32 = arith.constant 0 : i32
    %c0_i32_0 = arith.constant 0 : i32
    %c0_i32_1 = arith.constant 0 : i32
    return %c0_i32, %c0_i32_0 : i32, i32
  }
  func.func @transform_7(%arg0: i32) -> (i32, i32) {
    %c0_i32 = arith.constant 0 : i32
    %c0_i32_0 = arith.constant 0 : i32
    return %arg0, %c0_i32 : i32, i32
  }
}

module attributes {stable_mosaic.version = 11 : i64} {
  func.func @_gcn_phase1_kernel(%arg0: i32, %arg1: memref<32x32xf32, #tpu.memory_space<vmem>>, %arg2: memref<32x1xf32, #tpu.memory_space<vmem>>, %arg3: memref<1x32xf32, #tpu.memory_space<vmem>>, %arg4: memref<32x128xbf16, #tpu.memory_space<vmem>>, %arg5: memref<1x128xf32, #tpu.memory_space<vmem>>, %arg6: memref<128x128xbf16, #tpu.memory_space<vmem>>, %arg7: memref<32x128xbf16, #tpu.memory_space<vmem>>) attributes {dimension_semantics = [#tpu.dimension_semantics<parallel>], iteration_bounds = array<i64: 1>, scalar_prefetch = 0 : i64, scratch_operands = 0 : i64, tpu.core_type = #tpu.core_type<tc>, window_params = [{transform_indices = @transform_0, window_bounds = array<i64: 32, 32>}, {transform_indices = @transform_1, window_bounds = array<i64: 32, 1>}, {pipeline_mode = #tpu.pipeline_mode<synchronous>, transform_indices = @transform_2, window_bounds = array<i64: 1, 32>}, {pipeline_mode = #tpu.pipeline_mode<synchronous>, transform_indices = @transform_3, window_bounds = array<i64: 32, 128>}, {pipeline_mode = #tpu.pipeline_mode<synchronous>, transform_indices = @transform_4, window_bounds = array<i64: 1, 128>}, {pipeline_mode = #tpu.pipeline_mode<synchronous>, transform_indices = @transform_5, window_bounds = array<i64: 128, 128>}, {transform_indices = @transform_6, window_bounds = array<i64: 32, 128>}]} {
    %c0 = arith.constant 0 : index
    %c0_0 = arith.constant 0 : index
    %0 = vector.load %arg1[%c0, %c0_0] : memref<32x32xf32, #tpu.memory_space<vmem>>, vector<32x32xf32>
    %c0_1 = arith.constant 0 : index
    %c0_2 = arith.constant 0 : index
    %1 = vector.load %arg2[%c0_1, %c0_2] : memref<32x1xf32, #tpu.memory_space<vmem>>, vector<32x1xf32>
    %2 = vector.broadcast %1 : vector<32x1xf32> to vector<32x32xf32>
    %3 = arith.mulf %0, %2 : vector<32x32xf32>
    %c0_3 = arith.constant 0 : index
    %c0_4 = arith.constant 0 : index
    %4 = vector.load %arg3[%c0_3, %c0_4] : memref<1x32xf32, #tpu.memory_space<vmem>>, vector<1x32xf32>
    %5 = vector.broadcast %4 : vector<1x32xf32> to vector<32x32xf32>
    %6 = arith.mulf %3, %5 : vector<32x32xf32>
    %7 = arith.truncf %6 : vector<32x32xf32> to vector<32x32xbf16>
    %c0_5 = arith.constant 0 : index
    %c0_6 = arith.constant 0 : index
    %8 = vector.load %arg4[%c0_5, %c0_6] : memref<32x128xbf16, #tpu.memory_space<vmem>>, vector<32x128xbf16>
    %cst = arith.constant dense<0.000000e+00> : vector<32x128xf32>
    %9 = tpu.matmul %7, %8, %cst {dimension_numbers = #tpu.dot_dimension_numbers<[1], [0], [0], [1], [0, 0, 1, 1], [], []>} : vector<32x32xbf16>, vector<32x128xbf16>, vector<32x128xf32> -> vector<32x128xf32>
    %c0_7 = arith.constant 0 : index
    %c0_8 = arith.constant 0 : index
    %10 = vector.load %arg5[%c0_7, %c0_8] : memref<1x128xf32, #tpu.memory_space<vmem>>, vector<1x128xf32>
    %11 = vector.broadcast %10 : vector<1x128xf32> to vector<32x128xf32>
    %12 = arith.addf %9, %11 : vector<32x128xf32>
    %cst_9 = arith.constant 0.000000e+00 : f32
    %13 = vector.broadcast %cst_9 : f32 to vector<32x128xf32>
    %14 = arith.maximumf %12, %13 : vector<32x128xf32>
    %15 = arith.truncf %14 : vector<32x128xf32> to vector<32x128xbf16>
    %c0_10 = arith.constant 0 : index
    %c0_11 = arith.constant 0 : index
    %16 = vector.load %arg6[%c0_10, %c0_11] : memref<128x128xbf16, #tpu.memory_space<vmem>>, vector<128x128xbf16>
    %cst_12 = arith.constant dense<0.000000e+00> : vector<32x128xf32>
    %17 = tpu.matmul %15, %16, %cst_12 {dimension_numbers = #tpu.dot_dimension_numbers<[1], [0], [0], [1], [0, 0, 1, 1], [], []>} : vector<32x128xbf16>, vector<128x128xbf16>, vector<32x128xf32> -> vector<32x128xf32>
    %18 = arith.truncf %17 : vector<32x128xf32> to vector<32x128xbf16>
    %c0_13 = arith.constant 0 : index
    %c0_14 = arith.constant 0 : index
    %19 = vector.load %arg7[%c0_13, %c0_14] : memref<32x128xbf16, #tpu.memory_space<vmem>>, vector<32x128xbf16>
    tpu.vector_store %arg7[%c0_13, %c0_14], %18 {strides = array<i32>} : memref<32x128xbf16, #tpu.memory_space<vmem>>, vector<32x128xbf16>,
    return
  }
  func.func @transform_0(%arg0: i32) -> (i32, i32) {
    %c0_i32 = arith.constant 0 : i32
    %c0_i32_0 = arith.constant 0 : i32
    return %arg0, %c0_i32 : i32, i32
  }
  func.func @transform_1(%arg0: i32) -> (i32, i32) {
    %c0_i32 = arith.constant 0 : i32
    %c0_i32_0 = arith.constant 0 : i32
    return %arg0, %c0_i32 : i32, i32
  }
  func.func @transform_2(%arg0: i32) -> (i32, i32) {
    %c0_i32 = arith.constant 0 : i32
    %c0_i32_0 = arith.constant 0 : i32
    %c0_i32_1 = arith.constant 0 : i32
    return %c0_i32, %c0_i32_0 : i32, i32
  }
  func.func @transform_3(%arg0: i32) -> (i32, i32) {
    %c0_i32 = arith.constant 0 : i32
    %c0_i32_0 = arith.constant 0 : i32
    %c0_i32_1 = arith.constant 0 : i32
    return %c0_i32, %c0_i32_0 : i32, i32
  }
  func.func @transform_4(%arg0: i32) -> (i32, i32) {
    %c0_i32 = arith.constant 0 : i32
    %c0_i32_0 = arith.constant 0 : i32
    %c0_i32_1 = arith.constant 0 : i32
    return %c0_i32, %c0_i32_0 : i32, i32
  }
  func.func @transform_5(%arg0: i32) -> (i32, i32) {
    %c0_i32 = arith.constant 0 : i32
    %c0_i32_0 = arith.constant 0 : i32
    %c0_i32_1 = arith.constant 0 : i32
    return %c0_i32, %c0_i32_0 : i32, i32
  }
  func.func @transform_6(%arg0: i32) -> (i32, i32) {
    %c0_i32 = arith.constant 0 : i32
    %c0_i32_0 = arith.constant 0 : i32
    return %arg0, %c0_i32 : i32, i32
  }
}

module attributes {stable_mosaic.version = 11 : i64} {
  func.func @_lstm_chain_kernel(%arg0: i32, %arg1: memref<32x3x8xf32, #tpu.memory_space<vmem>>, %arg2: memref<3x8xf32, #tpu.memory_space<vmem>>, %arg3: memref<3x8xf32, #tpu.memory_space<vmem>>, %arg4: memref<32x3x2xf32, #tpu.memory_space<vmem>>) attributes {dimension_semantics = [#tpu.dimension_semantics<arbitrary>], iteration_bounds = array<i64: 1>, scalar_prefetch = 0 : i64, scratch_operands = 0 : i64, tpu.core_type = #tpu.core_type<tc>, window_params = [{pipeline_mode = #tpu.pipeline_mode<synchronous>, transform_indices = @transform_0, window_bounds = array<i64: 32, 3, 8>}, {pipeline_mode = #tpu.pipeline_mode<synchronous>, transform_indices = @transform_1, window_bounds = array<i64: 3, 8>}, {pipeline_mode = #tpu.pipeline_mode<synchronous>, transform_indices = @transform_2, window_bounds = array<i64: 3, 8>}, {pipeline_mode = #tpu.pipeline_mode<synchronous>, transform_indices = @transform_3, window_bounds = array<i64: 32, 3, 2>}]} {
    %c0 = arith.constant 0 : index
    %c0_0 = arith.constant 0 : index
    %0 = vector.load %arg2[%c0, %c0_0] : memref<3x8xf32, #tpu.memory_space<vmem>>, vector<3x8xf32>
    %c0_1 = arith.constant 0 : index
    %c0_2 = arith.constant 0 : index
    %1 = vector.load %arg3[%c0_1, %c0_2] : memref<3x8xf32, #tpu.memory_space<vmem>>, vector<3x8xf32>
    %cst = arith.constant 0.000000e+00 : f32
    %2 = vector.broadcast %cst : f32 to vector<3x2xf32>
    %c0_i32 = arith.constant 0 : i32
    %c32_i32 = arith.constant 32 : i32
    %3 = arith.addi %c0_i32, %c32_i32 : i32
    %c1_i32 = arith.constant 1 : i32
    %4:2 = scf.for %arg5 = %c0_i32 to %3 step %c1_i32 iter_args(%arg6 = %2, %arg7 = %2) -> (vector<3x2xf32>, vector<3x2xf32>)  : i32 {
      %5 = arith.index_cast %arg5 : i32 to index
      %c0_4 = arith.constant 0 : index
      %c0_5 = arith.constant 0 : index
      %6 = vector.load %arg1[%5, %c0_4, %c0_5] : memref<32x3x8xf32, #tpu.memory_space<vmem>>, vector<1x3x8xf32>
      %7 = vector.shape_cast %6 : vector<1x3x8xf32> to vector<3x8xf32>
      %8 = vector.extract_strided_slice %arg6 {offsets = [0, 0], sizes = [3, 1], strides = [1, 1]} : vector<3x2xf32> to vector<3x1xf32>
      %9 = vector.broadcast %8 : vector<3x1xf32> to vector<3x8xf32>
      %10 = arith.mulf %0, %9 : vector<3x8xf32>
      %11 = arith.addf %7, %10 : vector<3x8xf32>
      %12 = vector.extract_strided_slice %arg6 {offsets = [0, 1], sizes = [3, 1], strides = [1, 1]} : vector<3x2xf32> to vector<3x1xf32>
      %13 = vector.broadcast %12 : vector<3x1xf32> to vector<3x8xf32>
      %14 = arith.mulf %1, %13 : vector<3x8xf32>
      %15 = arith.addf %11, %14 : vector<3x8xf32>
      %16 = vector.extract_strided_slice %15 {offsets = [0, 0], sizes = [3, 2], strides = [1, 1]} : vector<3x8xf32> to vector<3x2xf32>
      %17 = arith.negf %16 : vector<3x2xf32>
      %18 = math.exp %17 : vector<3x2xf32>
      %cst_6 = arith.constant 1.000000e+00 : f32
      %19 = vector.broadcast %cst_6 : f32 to vector<3x2xf32>
      %20 = arith.addf %19, %18 : vector<3x2xf32>
      %21 = arith.divf %19, %20 : vector<3x2xf32>
      %22 = vector.extract_strided_slice %15 {offsets = [0, 2], sizes = [3, 2], strides = [1, 1]} : vector<3x8xf32> to vector<3x2xf32>
      %23 = arith.negf %22 : vector<3x2xf32>
      %24 = math.exp %23 : vector<3x2xf32>
      %cst_7 = arith.constant 1.000000e+00 : f32
      %25 = vector.broadcast %cst_7 : f32 to vector<3x2xf32>
      %26 = arith.addf %25, %24 : vector<3x2xf32>
      %27 = arith.divf %25, %26 : vector<3x2xf32>
      %28 = vector.extract_strided_slice %15 {offsets = [0, 4], sizes = [3, 2], strides = [1, 1]} : vector<3x8xf32> to vector<3x2xf32>
      %29 = math.tanh %28 : vector<3x2xf32>
      %30 = vector.extract_strided_slice %15 {offsets = [0, 6], sizes = [3, 2], strides = [1, 1]} : vector<3x8xf32> to vector<3x2xf32>
      %31 = arith.negf %30 : vector<3x2xf32>
      %32 = math.exp %31 : vector<3x2xf32>
      %cst_8 = arith.constant 1.000000e+00 : f32
      %33 = vector.broadcast %cst_8 : f32 to vector<3x2xf32>
      %34 = arith.addf %33, %32 : vector<3x2xf32>
      %35 = arith.divf %33, %34 : vector<3x2xf32>
      %36 = arith.mulf %27, %arg7 : vector<3x2xf32>
      %37 = arith.mulf %21, %29 : vector<3x2xf32>
      %38 = arith.addf %36, %37 : vector<3x2xf32>
      %39 = math.tanh %38 : vector<3x2xf32>
      %40 = arith.mulf %35, %39 : vector<3x2xf32>
      %41 = arith.index_cast %arg5 : i32 to index
      %c0_9 = arith.constant 0 : index
      %c0_10 = arith.constant 0 : index
      %42 = vector.load %arg4[%41, %c0_9, %c0_10] : memref<32x3x2xf32, #tpu.memory_space<vmem>>, vector<1x3x2xf32>
      %43 = vector.shape_cast %42 : vector<1x3x2xf32> to vector<3x2xf32>
      %44 = vector.shape_cast %40 : vector<3x2xf32> to vector<1x3x2xf32>
      tpu.vector_store %arg4[%41, %c0_9, %c0_10], %44 {strides = array<i32>} : memref<32x3x2xf32, #tpu.memory_space<vmem>>, vector<1x3x2xf32>,
      scf.yield %40, %38 : vector<3x2xf32>, vector<3x2xf32>
    }
    %c32_i32_3 = arith.constant 32 : i32
    return
  }
  func.func @transform_0(%arg0: i32) -> (i32, i32, i32) {
    %c0_i32 = arith.constant 0 : i32
    %c0_i32_0 = arith.constant 0 : i32
    %c0_i32_1 = arith.constant 0 : i32
    %c0_i32_2 = arith.constant 0 : i32
    return %c0_i32, %c0_i32_0, %c0_i32_1 : i32, i32, i32
  }
  func.func @transform_1(%arg0: i32) -> (i32, i32) {
    %c0_i32 = arith.constant 0 : i32
    %c0_i32_0 = arith.constant 0 : i32
    %c0_i32_1 = arith.constant 0 : i32
    return %c0_i32, %c0_i32_0 : i32, i32
  }
  func.func @transform_2(%arg0: i32) -> (i32, i32) {
    %c0_i32 = arith.constant 0 : i32
    %c0_i32_0 = arith.constant 0 : i32
    %c0_i32_1 = arith.constant 0 : i32
    return %c0_i32, %c0_i32_0 : i32, i32
  }
  func.func @transform_3(%arg0: i32) -> (i32, i32, i32) {
    %c0_i32 = arith.constant 0 : i32
    %c0_i32_0 = arith.constant 0 : i32
    %c0_i32_1 = arith.constant 0 : i32
    %c0_i32_2 = arith.constant 0 : i32
    return %c0_i32, %c0_i32_0, %c0_i32_1 : i32, i32, i32
  }
}

</mosaic_0001>

<bundles_post_ra>
// kernel: svga_forward.5
= control target key start
LH: loop header
LB: loop body
LE: loop exit
PB: predicated region body
PF: predicated region fallthrough
CT: control target
= control target key end

     0   :  { %v144_v2 = vmov 0.0   ;;  %v148_v3 = vmov 0.0   ;;  %s188_s16 = smov 0   ;;  %s207_s0 = inlined_call_operand.vmem [shape: f32[32,3,8], index: 0, kind: input, shape index: {}]   ;;  %s208_s1 = inlined_call_operand.vmem [shape: f32[3,8], index: 1, kind: input, shape index: {}]   ;;  %s209_s2 = inlined_call_operand.vmem [shape: f32[3,8], index: 2, kind: input, shape index: {}]   ;;  %s210_s3 = inlined_call_operand.vmem [shape: f32[32,3,2], index: 3, kind: output, shape index: {}]  }
   0x1   :  { %v14_v0 = vld [vmem:[%s208_s1] sm:$0x7] }
   0x2   :  { %v15_v1 = vld [vmem:[%s209_s2] sm:$0x7] }
   0x3 LB: > { %v156_v4 = vmov 6   ;;  %v157_v5 = vmov 7   ;;  %s90_s1 = sshll.u32 %s154_s16, 2  ;;  %s158_s19 = smov 124   ;;  %vm69_vm0 = vcmask 10240   ;;  %s154_s16 = sphi %s188_s16, %s21_s16   ;;  %v150_v3 = vphi %v148_v3, %v63_v3   ;;  %v146_v2 = vphi %v144_v2, %v57_v2  }
   0x4   : > { %122 = vset.pattern.permute.xlu0 %v156_v4  ;;  %s25_s18 = scalar_lea.vmem %s207_s0, %s90_s1  ;;  %s159_s20 = smov 2  }
   0x5   : > { %29 = vperm.xlu0 %122, %v150_v3   ;;  %v26_v8 = vld [vmem:[%s25_s18] sm:$0x7]  ;;  %s160_s21 = smov 4   ;;  %s161_s22 = smov 122  }
   0x6   : > { %s68_s25 = scalar_lea.vmem %s210_s3, %s90_s1  ;;  %s21_s16 = sadd.s32 1, %s154_s16  }
   0x7   : > { %p18_p0 = scmp.ge.s32.totalorder %s21_s16, 32  }
   0x9   : > { %123 = vset.pattern.permute.xlu0 %v157_v5 }
   0xa   : > { %35 = vperm.xlu0 %123, %v150_v3  }
  0x84   : > { %v30_v6 = vpop.permute.xlu0 %29 }
  0x85   : > { %v32_v7 = vmul.f32 %v30_v6, %v14_v0 }
  0x87   : > { %v33_v10 = vadd.f32 %v32_v7, %v26_v8 }
  0x89   : > { %v36_v9 = vpop.permute.xlu0 %35 }
  0x8a   : > { %v38_v11 = vmul.f32 %v36_v9, %v15_v1 }
  0x8c   : > { %v39_v12 = vadd.f32 %v38_v11, %v33_v10 }
  0x8e   : > { %124 = vtanh.f32 %v39_v12  ;;  %v91_v14 = vmul.f32 -1.442695, %v39_v12 }
  0x90   : > { %126 = vpow2.f32 %v91_v14 }
  0x98   : > { %v125_v13 = vpop.eup %124 }
  0x99   : > { %49 = vrot.lane.b32.xlu1 %v125_v13, %s158_s19 }
  0x9a   : > { %v127_v15 = vpop.eup %126 }
  0x9b   : > { %v43_v16 = vadd.f32 1.0, %v127_v15 }
  0x9d   : > { %128 = vrcp.f32 %v43_v16 }
  0xa7   : > { %v129_v17 = vpop.eup %128 }
  0xa8   : > { %v47_v20 = vmul.f32 %v146_v2, %v129_v17 }
 0x10b   : > { %v50_v18 = vpop.permute.xlu1 %49 }
 0x10c   : > { %v52_v19 = vmul.f32 %v129_v17, %v50_v18 }
 0x10e   : > { %54 = vrot.lane.b32.xlu1 %v52_v19, %s159_s20 }
 0x180   : > { %v55_v21 = vpop.permute.xlu1 %54 }
 0x181   : > { %v57_v2 = vadd.f32 %v55_v21, %v47_v20  }
 0x183   : > { %130 = vtanh.f32 %v57_v2 }
 0x18d   : > { %v131_v22 = vpop.eup %130 }
 0x18e   : > { %60 = vrot.lane.b32.xlu1 %v131_v22, %s160_s21 }
 0x200   : > { %v61_v23 = vpop.permute.xlu1 %60 }
 0x201   : > { %v63_v3 = vmul.f32 %v129_v17, %v61_v23  }
 0x203   : > { %65 = vrot.lane.b32.xlu0 %v63_v3, %s161_s22 }
 0x270   :  { %20 = sbr.rel (!%p18_p0) target bundleno = 3 (0x3), region = 41 }
 0x275   : > { %v66_v24 = vpop.permute.xlu0 %65 }
 0x276   : > { %70 = vst.msk [vmem:[%s68_s25] sm:$0x7] %vm69_vm0, %v66_v24 }

// kernel: svga_forward.4
= control target key start
LH: loop header
LB: loop body
LE: loop exit
PB: predicated region body
PF: predicated region fallthrough
CT: control target
= control target key end

     0   :  { %v407_v0 = vmov 0   ;;  %vm95_vm0 = vcmask 261120   ;;  %s568_s1 = inlined_call_operand.vmem [shape: f32[32,1], index: 1, kind: input, shape index: {}]   ;;  %s569_s3 = inlined_call_operand.vmem [shape: bf16[32,128], index: 3, kind: input, shape index: {}]   ;;  %s570_s0 = inlined_call_operand.vmem [shape: f32[32,32], index: 0, kind: input, shape index: {}]   ;;  %s571_s2 = inlined_call_operand.vmem [shape: f32[1,32], index: 2, kind: input, shape index: {}]   ;;  %s572_s5 = inlined_call_operand.vmem [shape: f32[32,128], index: 5, kind: input, shape index: {}]   ;;  %s573_s6 = inlined_call_operand.vmem [shape: bf16[128,128], index: 6, kind: input, shape index: {}]   ;;  %s574_s4 = inlined_call_operand.vmem [shape: f32[1,128], index: 4, kind: input, shape index: {}]   ;;  %s575_s7 = inlined_call_operand.vmem [shape: f32[32,128], index: 7, kind: output, shape index: {}]  }
   0x1   :  { %388 = vset.pattern.permute.xlu1 %v407_v0  ;;  %387 = vset.pattern.permute.xlu0 %v407_v0  ;;  %v33_v1 = vld [vmem:[%s568_s1 + $0x10] sm:$0xff]  ;;  %v31_v2 = vld [vmem:[%s568_s1] sm:$0xff]  ;;  %v34_v3 = vld [vmem:[%s568_s1 + $0x18] sm:$0xff] }
   0x2   :  { %47 = vperm.xlu1 %388, %v33_v1   ;;  %37 = vperm.xlu0 %387, %v31_v2   ;;  %v32_v4 = vld [vmem:[%s568_s1 + $0x8] sm:$0xff]  ;;  %v389_v5 = vld [vmem:[%s569_s3] sm:$0xff]   ;;  %v29_v8 = vld [vmem:[%s570_s0 + $0x10] sm:$0xff] }
   0x3   :  { %358 = vmatprep.subr.bf16.mxu0 %v389_v5  ;;  %v390_v6 = vld [vmem:[%s569_s3 + $0x8] sm:$0xff]   ;;  %v27_v10 = vld [vmem:[%s570_s0] sm:$0xff]  ;;  %v30_v11 = vld [vmem:[%s570_s0 + $0x18] sm:$0xff] }
   0x4   :  { %359 = vmatpush3.bf16.msra.mxu0 %v389_v5  ;;  %v28_v12 = vld [vmem:[%s570_s0 + $0x8] sm:$0xff]  ;;  %v330_v15 = vld [vmem:[%s571_s2] ss:$0 sm:$0xff]  ;;  %v510_v40 = vld [vmem:[%s572_s5 + $0x10] sm:$0xff] }
   0x5   :  { %360 = vmatprep.subr.bf16.mxu0 %v390_v6  ;;  %v484_v26 = vld [vmem:[%s572_s5 + $0x8] sm:$0xff]  ;;  %v491_v28 = vld [vmem:[%s572_s5] sm:$0xff]  ;;  %v185_v44 = vmul.f32 %v510_v40, %v510_v40  ;;  %v170_v45 = vld [vmem:[%s572_s5 + $0x18] sm:$0xff] }
   0x6   :  { %52 = vperm.xlu1 %388, %v34_v3   ;;  %42 = vperm.xlu0 %387, %v32_v4   ;;  %v184_v27 = vmul.f32 %v484_v26, %v484_v26  ;;  %v183_v29 = vmul.f32 %v491_v28, %v491_v28  ;;  %v391_v30 = vld [vmem:[%s573_s6] sm:$0xff]   ;;  %v186_v47 = vmul.f32 %v170_v45, %v170_v45  ;;  %v392_v48 = vld [vmem:[%s573_s6 + $0x8] sm:$0xff]   ;;  %v393_v49 = vld [vmem:[%s573_s6 + $0x10] sm:$0xff]  }
   0x7   :  { %366 = vmatprep.subr.bf16.mxu1 %v391_v30  ;;  %v331_v31 = vld [vmem:[%s574_s4] ss:$0 sm:$0xff]  ;;  %v394_v50 = vld [vmem:[%s573_s6 + $0x18] sm:$0xff]   ;;  %v396_v52 = vld [vmem:[%s573_s6 + $0x28] sm:$0xff]  }
   0x8   :  { %361 = vmatpush3.bf16.msra.mxu0 %v390_v6  ;;  %367 = vmatpush3.bf16.msra.mxu1 %v391_v30  ;;  %v395_v51 = vld [vmem:[%s573_s6 + $0x20] sm:$0xff]   ;;  %v397_v53 = vld [vmem:[%s573_s6 + $0x30] sm:$0xff]   ;;  %v398_v54 = vld [vmem:[%s573_s6 + $0x38] sm:$0xff]  }
   0x9   :  { %368 = vmatprep.subr.bf16.mxu1 %v392_v48 }
   0xc   :  { %369 = vmatpush3.bf16.msra.mxu1 %v392_v48 }
   0xd   :  { %370 = vmatprep.subr.bf16.mxu1 %v393_v49 }
  0x10   :  { %371 = vmatpush3.bf16.msra.mxu1 %v393_v49 }
  0x11   :  { %372 = vmatprep.subr.bf16.mxu1 %v394_v50 }
  0x14   :  { %373 = vmatpush3.bf16.msra.mxu1 %v394_v50 }
  0x15   :  { %374 = vmatprep.subr.bf16.mxu1 %v395_v51 }
  0x18   :  { %375 = vmatpush3.bf16.msra.mxu1 %v395_v51 }
  0x19   :  { %376 = vmatprep.subr.bf16.mxu1 %v396_v52 }
  0x1c   :  { %377 = vmatpush3.bf16.msra.mxu1 %v396_v52 }
  0x1d   :  { %378 = vmatprep.subr.bf16.mxu1 %v397_v53 }
  0x20   :  { %379 = vmatpush3.bf16.msra.mxu1 %v397_v53 }
  0x21   :  { %380 = vmatprep.subr.bf16.mxu1 %v398_v54 }
  0x24   :  { %381 = vmatpush3.bf16.msra.mxu1 %v398_v54 }
  0x25   :  { %189 = vadd.xlane.f32.xlu0 %v184_v27 }
  0x2a   :  { %187 = vadd.xlane.f32.xlu1 %v183_v29 }
  0x81   :  { %v48_v7 = vpop.permute.xlu1 %47  ;;  %v38_v9 = vpop.permute.xlu0 %37 }
  0x82   :  { %v57_v13 = vmul.f32 %v48_v7, %v29_v8  ;;  %v55_v14 = vmul.f32 %v38_v9, %v27_v10 }
  0x84   :  { %v68_v20 = vmul.f32 %v330_v15, %v57_v13  ;;  %v66_v21 = vmul.f32 %v330_v15, %v55_v14 }
  0x85   :  { %v53_v16 = vpop.permute.xlu1 %52  ;;  %v43_v17 = vpop.permute.xlu0 %42 }
  0x86   :  { %v58_v18 = vmul.f32 %v53_v16, %v30_v11  ;;  %v56_v19 = vmul.f32 %v43_v17, %v28_v12 }
  0x88   :  { %v69_v22 = vmul.f32 %v330_v15, %v58_v18  ;;  %v67_v23 = vmul.f32 %v330_v15, %v56_v19 }
  0x8a   :  { %v71_v24 = vpack.c.bf16 %v69_v22, %v68_v20  ;;  %v70_v25 = vpack.c.bf16 %v67_v23, %v66_v21 }
  0x8c   :  { %362 = vmatprep.mubr.msk.bf16.mxu0 %vm95_vm0, %v70_v25 }
  0x8d   :  { %363 = vmatmul.mubr.msk.bf16.vlgmr.msra.gmra.mrb[0].mxu0 %vm95_vm0, %v71_v24 }
  0xb2   :  { %v190_v55 = vpop.xlane.xlu0 %189 }
  0xb7   :  { %v188_v56 = vpop.xlane.xlu1 %187 }
 0x160   :  { %v364_v32 = vpop.f32.mrb[0].mxu0 }
 0x161   :  { %v501_v33 = vadd.f32 %v364_v32, %v331_v31  ;;  %v136_v34 = vpop.f32.mrb[1].mxu0 }
 0x162   :  { %v365_v35 = vpop.f32.mrb[2].mxu0  ;;  %v503_v36 = vadd.f32 %v331_v31, %v136_v34 }
 0x163   :  { %v139_v37 = vpop.f32.mrb[3].mxu0  ;;  %v153_v38 = vmul.f32 %v501_v33, %v501_v33  ;;  %v512_v42 = vadd.f32 %v365_v35, %v331_v31 }
 0x164   :  { %v140_v39 = vadd.f32 %v331_v31, %v139_v37  ;;  %v151_v43 = vmul.f32 %v503_v36, %v503_v36 }
 0x165   :  { %159 = vadd.xlane.f32.xlu0 %v153_v38  ;;  %v154_v46 = vmul.f32 %v512_v42, %v512_v42 }
 0x166   :  { %v152_v41 = vmul.f32 %v140_v39, %v140_v39 }
 0x168   :  { %157 = vadd.xlane.f32.xlu1 %v152_v41 }
 0x169   :  { %155 = vadd.xlane.f32.xlu0 %v151_v43 }
 0x16c   :  { %191 = vadd.xlane.f32.xlu1 %v185_v44 }
 0x16d   :  { %161 = vadd.xlane.f32.xlu0 %v154_v46 }
 0x171   :  { %193 = vadd.xlane.f32.xlu0 %v186_v47 }
 0x1f2   :  { %v160_v57 = vpop.xlane.xlu0 %159 }
 0x1f3   :  { %vm165_vm3 = vcmp.gt.f32.partialorder %v160_v57, 0.0 }
 0x1f4   :  { %v181_v12 = vsel %vm165_vm3, %v501_v33, %v510_v40 }
 0x1f5   :  { %v158_v58 = vpop.xlane.xlu1 %157 }
 0x1f6   :  { %vm164_vm1 = vcmp.gt.f32.partialorder %v158_v58, 0.0  ;;  %v156_v59 = vpop.xlane.xlu0 %155 }
 0x1f7   :  { %v196_v60 = vsel %vm164_vm1, %v158_v58, %v190_v55  ;;  %vm163_vm2 = vcmp.gt.f32.partialorder %v156_v59, 0.0  ;;  %v180_v4 = vsel %vm164_vm1, %v140_v39, %v484_v26 }
 0x1f8   :  { %399 = vrsqrt.f32 %v196_v60  ;;  %v195_v61 = vsel %vm163_vm2, %v156_v59, %v188_v56  ;;  %v179_v6 = vsel %vm163_vm2, %v503_v36, %v491_v28 }
 0x1f9   :  { %401 = vrsqrt.f32 %v195_v61  ;;  %v192_v62 = vpop.xlane.xlu1 %191 }
 0x1fa   :  { %v162_v63 = vpop.xlane.xlu0 %161  ;;  %v197_v0 = vsel %vm165_vm3, %v160_v57, %v192_v62 }
 0x1fb   :  { %403 = vrsqrt.f32 %v197_v0  ;;  %vm166_vm4 = vcmp.gt.f32.partialorder %v162_v63, 0.0 }
 0x1fc   :  { %v182_v13 = vsel %vm166_vm4, %v512_v42, %v170_v45 }
 0x1fe   :  { %v194_v1 = vpop.xlane.xlu0 %193 }
 0x1ff   :  { %v198_v2 = vsel %vm166_vm4, %v162_v63, %v194_v1 }
 0x200   :  { %405 = vrsqrt.f32 %v198_v2 }
 0x202   :  { %v400_v3 = vpop.eup %399 }
 0x203   :  { %v402_v5 = vpop.eup %401  ;;  %v204_v7 = vmul.f32 %v400_v3, %v180_v4 }
 0x204   :  { %v203_v8 = vmul.f32 %v402_v5, %v179_v6 }
 0x205   :  { %v404_v10 = vpop.eup %403 }
 0x206   :  { %v207_v9 = vpack.c.bf16 %v204_v7, %v203_v8  ;;  %v205_v14 = vmul.f32 %v404_v10, %v181_v12 }
 0x208   :  { %382 = vmatprep.mubr.bf16.mxu1 %v207_v9 }
 0x20a   :  { %v406_v11 = vpop.eup %405 }
 0x20b   :  { %v206_v15 = vmul.f32 %v406_v11, %v182_v13 }
 0x20d   :  { %v208_v16 = vpack.c.bf16 %v206_v15, %v205_v14 }
 0x20f   :  { %383 = vmatmul.mubr.bf16.vlgmr.msra.gmra.mrb[0].mxu1 %v208_v16 }
 0x2e2   :  { %v384_v17 = vpop.f32.mrb[0].mxu1 }
 0x2e3   :  { %324 = vst [vmem:[%s575_s7 + $0x10] sm:$0xff] %v384_v17  ;;  %v307_v18 = vpop.f32.mrb[1].mxu1 }
 0x2e4   :  { %322 = vst [vmem:[%s575_s7] sm:$0xff] %v307_v18  ;;  %v385_v19 = vpop.f32.mrb[2].mxu1 }
 0x2e5   :  { %325 = vst [vmem:[%s575_s7 + $0x18] sm:$0xff] %v385_v19  ;;  %v310_v20 = vpop.f32.mrb[3].mxu1 }
 0x2e6   :  { %323 = vst [vmem:[%s575_s7 + $0x8] sm:$0xff] %v310_v20 }

// kernel: svga_forward.3
= control target key start
LH: loop header
LB: loop body
LE: loop exit
PB: predicated region body
PF: predicated region fallthrough
CT: control target
= control target key end

     0   :  { %11 = vsyncpa [#allocation3], 0  ;;  %s421_s21 = smov [#allocation2]   ;;  %s526_s0 = inlined_call_operand.hbm [shape: f32[32,32], index: 0, kind: input, shape index: {}]   ;;  %s527_s1 = inlined_call_operand.vmem [shape: f32[32,1], index: 1, kind: input, shape index: {}]   ;;  %s528_s2 = inlined_call_operand.vmem [shape: f32[1,32], index: 2, kind: input, shape index: {}]   ;;  %s529_s3 = inlined_call_operand.vmem [shape: bf16[32,128], index: 3, kind: input, shape index: {}]   ;;  %s530_s4 = inlined_call_operand.vmem [shape: f32[1,128], index: 4, kind: input, shape index: {}]   ;;  %s531_s5 = inlined_call_operand.vmem [shape: bf16[128,128], index: 5, kind: input, shape index: {}]   ;;  %s532_s6 = inlined_call_operand.vmem [shape: bf16[32,128], index: 6, kind: output, shape index: {}]  }
   0x1   :  { %s17_s22 = sshll.u32 %s421_s21, 4  ;;  %s397_s25 = scalar_lea.hbm %s526_s0, 512  ;;  %s18_s22 = int_to_ptr.vmem [resolvable:$true] %s17_s22 }
   0x2   :  { %p398_p0 = scmp.ne.s32.totalorder %s526_s0, %s397_s25  ;;  %p401_p1 = scmp.lt.u32.totalorder %s397_s25, %s526_s0 }
   0x4   :  { %p403_p2 = pnand %p401_p1, %p398_p0 }
   0x6   :  { %406 = shalt.err (!%p403_p2)
}
   0x7   :  { %s407_s30 = scalar_lea.vmem %s18_s22, 512  ;;  %p412_p4 = scmp.lt.s32.totalorder %s18_s22, %s18_s22 }
   0x8   :  { %p408_p3 = scmp.ne.s32.totalorder %s18_s22, %s407_s30  ;;  %p413_p5 = scmp.lt.s32.totalorder %s407_s30, %s407_s30 }
   0xa   :  { %p414_p6 = por %p413_p5, %p412_p4 }
   0xc   :  { %p415_p7 = pnand %p414_p6, %p408_p3 }
   0xe   :  { %418 = shalt.err (!%p415_p7)
}
   0xf   :  { %s422_s7 = smov 128   ;;  %s423_s8 = smov 8  }
  0x10   :  { %23 = dma.hbm_to_vmem [thread:$0]  %s526_s0, 512, %s18_s22, [#allocation3], %s422_s7, %s422_s7, %s423_s8  }
  0x11   :  { %419 = dma.done.wait [#allocation3], 512  }
  0x12   :  { %420 = vsyncadd [#allocation3], 4294966784  ;;  %v424_v0 = vmov 0   ;;  %v44_v1 = vld [vmem:[%s527_s1 + $0x10] sm:$0xff]  ;;  %v42_v2 = vld [vmem:[%s527_s1] sm:$0xff]  ;;  %vm106_vm0 = vcmask 261120  }
  0x13   :  { %386 = vset.pattern.permute.xlu1 %v424_v0  ;;  %385 = vset.pattern.permute.xlu0 %v424_v0  ;;  %v45_v3 = vld [vmem:[%s527_s1 + $0x18] sm:$0xff]  ;;  %v43_v4 = vld [vmem:[%s527_s1 + $0x8] sm:$0xff]  ;;  %v387_v5 = vld [vmem:[%s529_s3] sm:$0xff]  }
  0x14   :  { %58 = vperm.xlu1 %386, %v44_v1   ;;  %48 = vperm.xlu0 %385, %v42_v2   ;;  %v388_v6 = vld [vmem:[%s529_s3 + $0x8] sm:$0xff]   ;;  %v389_v7 = vld [vmem:[%s531_s5] sm:$0xff]   ;;  %v391_v9 = vld [vmem:[%s531_s5 + $0x10] sm:$0xff]  }
  0x15   :  { %353 = vmatprep.subr.bf16.mxu0 %v387_v5  ;;  %v390_v8 = vld [vmem:[%s531_s5 + $0x8] sm:$0xff]   ;;  %361 = vmatprep.subr.bf16.mxu1 %v389_v7  ;;  %v392_v10 = vld [vmem:[%s531_s5 + $0x18] sm:$0xff]   ;;  %v393_v11 = vld [vmem:[%s531_s5 + $0x20] sm:$0xff]  }
  0x16   :  { %354 = vmatpush3.bf16.msra.mxu0 %v387_v5  ;;  %362 = vmatpush3.bf16.msra.mxu1 %v389_v7  ;;  %v394_v12 = vld [vmem:[%s531_s5 + $0x28] sm:$0xff]   ;;  %v40_v14 = vld [vmem:[#allocation2 + $0x10] sm:$0xff]  ;;  %v38_v16 = vld [vmem:[#allocation2] sm:$0xff] }
  0x17   :  { %355 = vmatprep.subr.bf16.mxu0 %v388_v6  ;;  %363 = vmatprep.subr.bf16.mxu1 %v390_v8  ;;  %v41_v17 = vld [vmem:[#allocation2 + $0x18] sm:$0xff]  ;;  %v39_v18 = vld [vmem:[#allocation2 + $0x8] sm:$0xff]  ;;  %v306_v21 = vld [vmem:[%s528_s2] ss:$0 sm:$0xff] }
  0x18   :  { %63 = vperm.xlu1 %386, %v45_v3   ;;  %53 = vperm.xlu0 %385, %v43_v4   ;;  %v395_v32 = vld [vmem:[%s531_s5 + $0x30] sm:$0xff]   ;;  %v396_v33 = vld [vmem:[%s531_s5 + $0x38] sm:$0xff]   ;;  %v307_v34 = vld [vmem:[%s530_s4] ss:$0 sm:$0xff] }
  0x1a   :  { %356 = vmatpush3.bf16.msra.mxu0 %v388_v6  ;;  %364 = vmatpush3.bf16.msra.mxu1 %v390_v8 }
  0x1b   :  { %365 = vmatprep.subr.bf16.mxu1 %v391_v9 }
  0x1e   :  { %366 = vmatpush3.bf16.msra.mxu1 %v391_v9 }
  0x1f   :  { %367 = vmatprep.subr.bf16.mxu1 %v392_v10 }
  0x22   :  { %368 = vmatpush3.bf16.msra.mxu1 %v392_v10 }
  0x23   :  { %369 = vmatprep.subr.bf16.mxu1 %v393_v11 }
  0x26   :  { %370 = vmatpush3.bf16.msra.mxu1 %v393_v11 }
  0x27   :  { %371 = vmatprep.subr.bf16.mxu1 %v394_v12 }
  0x2a   :  { %372 = vmatpush3.bf16.msra.mxu1 %v394_v12 }
  0x2b   :  { %373 = vmatprep.subr.bf16.mxu1 %v395_v32 }
  0x2e   :  { %374 = vmatpush3.bf16.msra.mxu1 %v395_v32 }
  0x2f   :  { %375 = vmatprep.subr.bf16.mxu1 %v396_v33 }
  0x32   :  { %376 = vmatpush3.bf16.msra.mxu1 %v396_v33 }
  0x93   :  { %v59_v13 = vpop.permute.xlu1 %58  ;;  %v49_v15 = vpop.permute.xlu0 %48 }
  0x94   :  { %v68_v19 = vmul.f32 %v59_v13, %v40_v14  ;;  %v66_v20 = vmul.f32 %v49_v15, %v38_v16 }
  0x96   :  { %v79_v26 = vmul.f32 %v306_v21, %v68_v19  ;;  %v77_v27 = vmul.f32 %v306_v21, %v66_v20 }
  0x97   :  { %v64_v22 = vpop.permute.xlu1 %63  ;;  %v54_v23 = vpop.permute.xlu0 %53 }
  0x98   :  { %v69_v24 = vmul.f32 %v64_v22, %v41_v17  ;;  %v67_v25 = vmul.f32 %v54_v23, %v39_v18 }
  0x9a   :  { %v80_v28 = vmul.f32 %v306_v21, %v69_v24  ;;  %v78_v29 = vmul.f32 %v306_v21, %v67_v25 }
  0x9c   :  { %v82_v30 = vpack.c.bf16 %v80_v28, %v79_v26  ;;  %v81_v31 = vpack.c.bf16 %v78_v29, %v77_v27 }
  0x9e   :  { %357 = vmatprep.mubr.msk.bf16.mxu0 %vm106_vm0, %v81_v31 }
  0x9f   :  { %358 = vmatmul.mubr.msk.bf16.vlgmr.msra.gmra.mrb[0].mxu0 %vm106_vm0, %v82_v30 }
 0x172   :  { %v359_v35 = vpop.f32.mrb[0].mxu0 }
 0x173   :  { %v156_v36 = vadd.f32 %v359_v35, %v307_v34  ;;  %v147_v37 = vpop.f32.mrb[1].mxu0 }
 0x174   :  { %v148_v38 = vadd.f32 %v307_v34, %v147_v37  ;;  %v360_v39 = vpop.f32.mrb[2].mxu0 }
 0x175   :  { %v159_v40 = vadd.f32 %v360_v39, %v307_v34  ;;  %v150_v41 = vpop.f32.mrb[3].mxu0  ;;  %v164_v43 = vmax.f32 %v156_v36, 0.0 }
 0x176   :  { %v151_v42 = vadd.f32 %v307_v34, %v150_v41  ;;  %v162_v45 = vmax.f32 %v148_v38, 0.0 }
 0x177   :  { %v165_v44 = vmax.f32 %v159_v40, 0.0 }
 0x178   :  { %v163_v46 = vmax.f32 %v151_v42, 0.0 }
 0x179   :  { %v167_v47 = vpack.c.bf16 %v165_v44, %v164_v43 }
 0x17a   :  { %v166_v48 = vpack.c.bf16 %v163_v46, %v162_v45 }
 0x17c   :  { %377 = vmatprep.mubr.bf16.mxu1 %v166_v48 }
 0x17d   :  { %378 = vmatmul.mubr.bf16.vlgmr.msra.gmra.mrb[0].mxu1 %v167_v47 }
 0x250   :  { %v379_v49 = vpop.f32.mrb[0].mxu1 }
 0x251   :  { %v266_v50 = vpop.f32.mrb[1].mxu1 }
 0x252   :  { %v380_v51 = vpop.f32.mrb[2].mxu1 }
 0x253   :  { %v336_v52 = vpack.c.bf16 %v380_v51, %v379_v49  ;;  %v269_v53 = vpop.f32.mrb[3].mxu1 }
 0x254   :  { %v331_v54 = vpack.c.bf16 %v269_v53, %v266_v50 }
 0x255   :  { %338 = vst [vmem:[%s532_s6 + $0x8] sm:$0xff] %v336_v52  }
 0x256   :  { %332 = vst [vmem:[%s532_s6] sm:$0xff] %v331_v54  }
 0x257   :  { %305 = vsyncpa [#allocation3], 1 }

</bundles_post_ra>
